<compile_context>
chip_gen: v7x
topology: tpu7x:2x2x1
jax: 0.10.0
libtpu: 0.0.40
codegen_flags: <defaults>
</compile_context>

<pallas_src>
import functools

import jax
import jax.numpy as jnp
from jax.experimental import pallas as pl
from jax.experimental.pallas import tpu as pltpu


def distillnet_kernel(x_ref, w1_ref, b1_ref, w2_ref, b2_ref, w3_ref, b3_ref,
                      o_ref, *, reduce_final):
    # l1 + ReLU  (bf16 MXU inputs, f32 accumulation, f32 epilogue)
    h = jnp.dot(x_ref[...], w1_ref[...],
                preferred_element_type=jnp.float32) + b1_ref[...]
    h = jnp.maximum(h, 0.0)

    # Dropout(p=0.05): identity at inference time.
    # TODO(synk): training-mode stochastic dropout not implemented (inference semantics).

    # l2 with eval-mode BatchNorm pre-folded into (w2, b2) on the host, then ReLU.
    h = jnp.dot(h.astype(w2_ref.dtype), w2_ref[...],
                preferred_element_type=jnp.float32) + b2_ref[...]
    h = jnp.maximum(h, 0.0)

    # l3: an N=1 MXU matmul wastes a full push/pop -> lane reduction when num_classes == 1.
    if reduce_final:
        z = jnp.sum(h * w3_ref[...], axis=-1, keepdims=True) + b3_ref[...]
    else:
        z = jnp.dot(h.astype(w3_ref.dtype), w3_ref[...],
                    preferred_element_type=jnp.float32) + b3_ref[...]

    # Sigmoid: exp and reciprocal both route to the EUP slot (no f32 VPU divide).
    o_ref[...] = pl.reciprocal(1.0 + jnp.exp(-z), approx=True)


def _pick_tile_b(B, max_tile=512):
    """Whole batch if it fits in one tile, else the largest divisor of B <= max_tile
    that is a multiple of 16 (bf16 sublane-pack aligned)."""
    if B <= max_tile:
        return B
    for t in range(max_tile, 15, -16):
        if B % t == 0:
            return t
    return B  # awkward batch size: fall back to a single block


def distillnet_forward(x, kernel_params, *, tile_b=None):
    """Fused forward pass. x: [B, input_size]. kernel_params from prepare_params()."""
    w1, b1, w2, b2, w3, b3 = kernel_params
    B, D = x.shape
    H1 = w1.shape[1]
    H2 = w2.shape[1]
    C = b3.shape[1]
    reduce_final = (C == 1)  # in that case w3 is a [1, H2] f32 row

    if tile_b is None:
        tile_b = _pick_tile_b(B)
    assert B % tile_b == 0
    num_tiles = B // tile_b

    x = x.astype(w1.dtype)  # bf16 MXU input; accumulation stays f32 in-kernel

    # Weights / biases are tiny and replicated across grid steps (constant index_map);
    # they live entirely in VMEM.  For v7x reuse with much larger hidden sizes, consider
    # pipeline_mode=pl.Buffered(1) on these specs and vmem_limit_bytes in
    # pltpu.CompilerParams to stay inside the 64 MiB / 32 MiB-scoped VMEM budget.
    def rep(arr):
        return pl.BlockSpec(arr.shape, lambda i: (0, 0))

    nbytes = lambda a: a.size * a.dtype.itemsize
    cost = pl.CostEstimate(
        flops=2 * B * (D * H1 + H1 * H2 + H2 * C),
        transcendentals=2 * B * C,  # exp + reciprocal
        bytes_accessed=nbytes(x) + sum(nbytes(a) for a in kernel_params) + B * C * 4,
    )

    return pl.pallas_call(
        functools.partial(distillnet_kernel, reduce_final=reduce_final),
        out_shape=jax.ShapeDtypeStruct((B, C), jnp.float32),
        grid=(num_tiles,),
        in_specs=[
            pl.BlockSpec((tile_b, D), lambda i: (i, 0)),   # x tile (batch on sublanes)
            rep(w1), rep(b1),
            rep(w2), rep(b2),
            rep(w3), rep(b3),
        ],
        out_specs=pl.BlockSpec((tile_b, C), lambda i: (i, 0)),
        compiler_params=pltpu.CompilerParams(
            # Batch axis is embarrassingly parallel: lets v7x shard grid steps across
            # its two TensorCores whenever B is large enough for num_tiles >= 2.
            dimension_semantics=("parallel",)),
        cost_estimate=cost,
    )(x, w1, b1, w2, b2, w3, b3)


def prepare_params(params, *, eps=1e-5, mxu_dtype=jnp.bfloat16):
    """Fold eval-mode BatchNorm into l2 and lay params out for the kernel.

    Linear weights are pre-transposed to [in, out] (PyTorch stores [out, in]) and cast to
    bf16 for the MXU; biases and the num_classes==1 output row stay f32 for the VPU.
    """
    w1, b1, w2, b2, gamma, beta, mean, var, w3, b3 = params
    s = gamma * jax.lax.rsqrt(var + eps)            # [1, H2]
    w2_f = w2 * s                                   # scale each output column of l2
    b2_f = (b2 - mean) * s + beta
    C = w3.shape[1]
    if C == 1:
        w3_k = w3.reshape(1, -1).astype(jnp.float32)   # [1, H2] row for the lane reduction
    else:
        w3_k = w3.astype(mxu_dtype)
    return (w1.astype(mxu_dtype), b1.astype(jnp.float32),
            w2_f.astype(mxu_dtype), b2_f.astype(jnp.float32),
            w3_k, b3.astype(jnp.float32))


def init_params(key, input_size, h1, h2, num_classes):
    """Deterministic init mimicking PyTorch nn.Linear default U[-1/sqrt(fan_in), 1/sqrt(fan_in)]."""
    k = jax.random.split(key, 6)

    def lin(kw, kb, fan_in, fan_out):
        bound = 1.0 / (fan_in ** 0.5)
        w = jax.random.uniform(kw, (fan_in, fan_out), jnp.float32, -bound, bound)
        b = jax.random.uniform(kb, (1, fan_out), jnp.float32, -bound, bound)
        return w, b

    w1, b1 = lin(k[0], k[1], input_size, h1)
    w2, b2 = lin(k[2], k[3], h1, h2)
    w3, b3 = lin(k[4], k[5], h2, num_classes)
    gamma = jnp.ones((1, h2), jnp.float32)
    beta = jnp.zeros((1, h2), jnp.float32)
    running_mean = jnp.zeros((1, h2), jnp.float32)
    running_var = jnp.ones((1, h2), jnp.float32)
    return (w1, b1, w2, b2, gamma, beta, running_mean, running_var, w3, b3)


if __name__ == "__main__":
    B, INPUT, H1, H2, NUM_CLASSES = 64, 32, 64, 32, 1

    key = jax.random.PRNGKey(0)
    pkey, xkey = jax.random.split(key)
    params = init_params(pkey, INPUT, H1, H2, NUM_CLASSES)
    x = jax.random.normal(xkey, (B, INPUT), jnp.float32)

    kparams = prepare_params(params)
    out = distillnet_forward(x, kparams)
    out = jax.block_until_ready(out)

    # Plain-JAX float32 reference (eval-mode semantics).
    w1, b1, w2, b2, gamma, beta, mean, var, w3, b3 = params
    h = jnp.maximum(x @ w1 + b1, 0.0)
    h = h @ w2 + b2
    h = (h - mean) * jax.lax.rsqrt(var + 1e-5) * gamma + beta
    h = jnp.maximum(h, 0.0)
    ref = jax.nn.sigmoid(h @ w3 + b3)

    assert out.shape == (B, NUM_CLASSES)
    err = float(jnp.max(jnp.abs(out - ref)))
    # bf16 MXU inputs -> compare against the f32 reference with a bf16-sized tolerance.
    assert err < 2e-2, err
    print("KERNEL_OK")
</pallas_src>

<mosaic_0001>
module attributes {stable_mosaic.version = 11 : i64} {
  func.func @distillnet_kernel(%arg0: i32, %arg1: memref<64x32xbf16, #tpu.memory_space<vmem>>, %arg2: memref<32x64xbf16, #tpu.memory_space<vmem>>, %arg3: memref<1x64xf32, #tpu.memory_space<vmem>>, %arg4: memref<64x32xbf16, #tpu.memory_space<vmem>>, %arg5: memref<1x32xf32, #tpu.memory_space<vmem>>, %arg6: memref<1x32xf32, #tpu.memory_space<vmem>>, %arg7: memref<1x1xf32, #tpu.memory_space<vmem>>, %arg8: memref<64x1xf32, #tpu.memory_space<vmem>>) attributes {dimension_semantics = [#tpu.dimension_semantics<parallel>], iteration_bounds = array<i64: 1>, scalar_prefetch = 0 : i64, scratch_operands = 0 : i64, tpu.core_type = #tpu.core_type<tc>, window_params = [{transform_indices = @transform_0, window_bounds = array<i64: 64, 32>}, {pipeline_mode = #tpu.pipeline_mode<synchronous>, transform_indices = @transform_1, window_bounds = array<i64: 32, 64>}, {pipeline_mode = #tpu.pipeline_mode<synchronous>, transform_indices = @transform_2, window_bounds = array<i64: 1, 64>}, {pipeline_mode = #tpu.pipeline_mode<synchronous>, transform_indices = @transform_3, window_bounds = array<i64: 64, 32>}, {pipeline_mode = #tpu.pipeline_mode<synchronous>, transform_indices = @transform_4, window_bounds = array<i64: 1, 32>}, {pipeline_mode = #tpu.pipeline_mode<synchronous>, transform_indices = @transform_5, window_bounds = array<i64: 1, 32>}, {pipeline_mode = #tpu.pipeline_mode<synchronous>, transform_indices = @transform_6, window_bounds = array<i64: 1, 1>}, {transform_indices = @transform_7, window_bounds = array<i64: 64, 1>}]} {
    %c0 = arith.constant 0 : index
    %c0_0 = arith.constant 0 : index
    %0 = vector.load %arg1[%c0, %c0_0] : memref<64x32xbf16, #tpu.memory_space<vmem>>, vector<64x32xbf16>
    %c0_1 = arith.constant 0 : index
    %c0_2 = arith.constant 0 : index
    %1 = vector.load %arg2[%c0_1, %c0_2] : memref<32x64xbf16, #tpu.memory_space<vmem>>, vector<32x64xbf16>
    %cst = arith.constant dense<0.000000e+00> : vector<64x64xf32>
    %2 = tpu.matmul %0, %1, %cst {dimension_numbers = #tpu.dot_dimension_numbers<[1], [0], [0], [1], [0, 0, 1, 1], [], []>} : vector<64x32xbf16>, vector<32x64xbf16>, vector<64x64xf32> -> vector<64x64xf32>
    %c0_3 = arith.constant 0 : index
    %c0_4 = arith.constant 0 : index
    %3 = vector.load %arg3[%c0_3, %c0_4] : memref<1x64xf32, #tpu.memory_space<vmem>>, vector<1x64xf32>
    %4 = vector.broadcast %3 : vector<1x64xf32> to vector<64x64xf32>
    %5 = arith.addf %2, %4 : vector<64x64xf32>
    %cst_5 = arith.constant 0.000000e+00 : f32
    %6 = vector.broadcast %cst_5 : f32 to vector<64x64xf32>
    %7 = arith.maximumf %5, %6 : vector<64x64xf32>
    %8 = arith.truncf %7 : vector<64x64xf32> to vector<64x64xbf16>
    %c0_6 = arith.constant 0 : index
    %c0_7 = arith.constant 0 : index
    %9 = vector.load %arg4[%c0_6, %c0_7] : memref<64x32xbf16, #tpu.memory_space<vmem>>, vector<64x32xbf16>
    %cst_8 = arith.constant dense<0.000000e+00> : vector<64x32xf32>
    %10 = tpu.matmul %8, %9, %cst_8 {dimension_numbers = #tpu.dot_dimension_numbers<[1], [0], [0], [1], [0, 0, 1, 1], [], []>} : vector<64x64xbf16>, vector<64x32xbf16>, vector<64x32xf32> -> vector<64x32xf32>
    %c0_9 = arith.constant 0 : index
    %c0_10 = arith.constant 0 : index
    %11 = vector.load %arg5[%c0_9, %c0_10] : memref<1x32xf32, #tpu.memory_space<vmem>>, vector<1x32xf32>
    %12 = vector.broadcast %11 : vector<1x32xf32> to vector<64x32xf32>
    %13 = arith.addf %10, %12 : vector<64x32xf32>
    %cst_11 = arith.constant 0.000000e+00 : f32
    %14 = vector.broadcast %cst_11 : f32 to vector<64x32xf32>
    %15 = arith.maximumf %13, %14 : vector<64x32xf32>
    %c0_12 = arith.constant 0 : index
    %c0_13 = arith.constant 0 : index
    %16 = vector.load %arg6[%c0_12, %c0_13] : memref<1x32xf32, #tpu.memory_space<vmem>>, vector<1x32xf32>
    %17 = vector.broadcast %16 : vector<1x32xf32> to vector<64x32xf32>
    %18 = arith.mulf %15, %17 : vector<64x32xf32>
    %cst_14 = arith.constant dense<0.000000e+00> : vector<64xf32>
    %19 = vector.multi_reduction <add>, %18, %cst_14 [1] : vector<64x32xf32> to vector<64xf32>
    %20 = vector.shape_cast %19 : vector<64xf32> to vector<64x1xf32>
    %c0_15 = arith.constant 0 : index
    %c0_16 = arith.constant 0 : index
    %21 = vector.load %arg7[%c0_15, %c0_16] : memref<1x1xf32, #tpu.memory_space<vmem>>, vector<1x1xf32>
    %22 = vector.broadcast %21 : vector<1x1xf32> to vector<64x1xf32>
    %23 = arith.addf %20, %22 : vector<64x1xf32>
    %cst_17 = arith.constant 0.000000e+00 : f32
    %24 = vector.broadcast %cst_17 : f32 to vector<64x1xf32>
    %25 = arith.subf %24, %23 : vector<64x1xf32>
    %26 = math.exp %25 : vector<64x1xf32>
    %cst_18 = arith.constant 1.000000e+00 : f32
    %27 = vector.broadcast %cst_18 : f32 to vector<64x1xf32>
    %28 = arith.addf %27, %26 : vector<64x1xf32>
    %29 = tpu.reciprocal %28 {approx = true} : vector<64x1xf32> -> vector<64x1xf32>
    %c0_19 = arith.constant 0 : index
    %c0_20 = arith.constant 0 : index
    %30 = vector.load %arg8[%c0_19, %c0_20] : memref<64x1xf32, #tpu.memory_space<vmem>>, vector<64x1xf32>
    tpu.vector_store %arg8[%c0_19, %c0_20], %29 {strides = array<i32>} : memref<64x1xf32, #tpu.memory_space<vmem>>, vector<64x1xf32>,
    return
  }
  func.func @transform_0(%arg0: i32) -> (i32, i32) {
    %c0_i32 = arith.constant 0 : i32
    %c0_i32_0 = arith.constant 0 : i32
    return %arg0, %c0_i32 : i32, i32
  }
  func.func @transform_1(%arg0: i32) -> (i32, i32) {
    %c0_i32 = arith.constant 0 : i32
    %c0_i32_0 = arith.constant 0 : i32
    %c0_i32_1 = arith.constant 0 : i32
    return %c0_i32, %c0_i32_0 : i32, i32
  }
  func.func @transform_2(%arg0: i32) -> (i32, i32) {
    %c0_i32 = arith.constant 0 : i32
    %c0_i32_0 = arith.constant 0 : i32
    %c0_i32_1 = arith.constant 0 : i32
    return %c0_i32, %c0_i32_0 : i32, i32
  }
  func.func @transform_3(%arg0: i32) -> (i32, i32) {
    %c0_i32 = arith.constant 0 : i32
    %c0_i32_0 = arith.constant 0 : i32
    %c0_i32_1 = arith.constant 0 : i32
    return %c0_i32, %c0_i32_0 : i32, i32
  }
  func.func @transform_4(%arg0: i32) -> (i32, i32) {
    %c0_i32 = arith.constant 0 : i32
    %c0_i32_0 = arith.constant 0 : i32
    %c0_i32_1 = arith.constant 0 : i32
    return %c0_i32, %c0_i32_0 : i32, i32
  }
  func.func @transform_5(%arg0: i32) -> (i32, i32) {
    %c0_i32 = arith.constant 0 : i32
    %c0_i32_0 = arith.constant 0 : i32
    %c0_i32_1 = arith.constant 0 : i32
    return %c0_i32, %c0_i32_0 : i32, i32
  }
  func.func @transform_6(%arg0: i32) -> (i32, i32) {
    %c0_i32 = arith.constant 0 : i32
    %c0_i32_0 = arith.constant 0 : i32
    %c0_i32_1 = arith.constant 0 : i32
    return %c0_i32, %c0_i32_0 : i32, i32
  }
  func.func @transform_7(%arg0: i32) -> (i32, i32) {
    %c0_i32 = arith.constant 0 : i32
    %c0_i32_0 = arith.constant 0 : i32
    return %arg0, %c0_i32 : i32, i32
  }
}

</mosaic_0001>

<bundles_post_ra>
// kernel: tpu_custom_call.1
= control target key start
LH: loop header
LB: loop body
LE: loop exit
PB: predicated region body
PF: predicated region fallthrough
CT: control target
= control target key end

     0   :  { %vm80_vm0 = vcmask 261120   ;;  %vm209_vm1 = vcmask 523264   ;;  %vm389_vm2 = vcmask 7168   ;;  %s638_s1 = inlined_call_operand.vmem [shape: bf16[32,64], index: 1, kind: input, shape index: {}]   ;;  %s639_s0 = inlined_call_operand.vmem [shape: bf16[64,32], index: 0, kind: input, shape index: {}]   ;;  %s640_s3 = inlined_call_operand.vmem [shape: bf16[64,32], index: 3, kind: input, shape index: {}]   ;;  %s641_s2 = inlined_call_operand.vmem [shape: f32[1,64], index: 2, kind: input, shape index: {}]   ;;  %s642_s6 = inlined_call_operand.<no memory space> [shape: f32[1,1], index: 6, kind: input, shape index: {}]   ;;  %s643_s4 = inlined_call_operand.vmem [shape: f32[1,32], index: 4, kind: input, shape index: {}]   ;;  %s644_s5 = inlined_call_operand.vmem [shape: f32[1,32], index: 5, kind: input, shape index: {}]   ;;  %s645_s7 = inlined_call_operand.vmem [shape: f32[64,1], index: 7, kind: output, shape index: {}]  }
   0x1   :  { %v466_v0 = vld [vmem:[%s638_s1] sm:$0xff]   ;;  %v467_v1 = vld [vmem:[%s638_s1 + $0x8] sm:$0xff]   ;;  %v470_v4 = vld [vmem:[%s639_s0 + $0x10] sm:$0xff]   ;;  %v12_v39 = vstv %s642_s6 }
   0x2   :  { %438 = vmatprep.subr.bf16.mxu0 %v466_v0  ;;  %v468_v2 = vld [vmem:[%s639_s0] sm:$0xff]   ;;  %v469_v3 = vld [vmem:[%s639_s0 + $0x8] sm:$0xff]   ;;  %v471_v7 = vld [vmem:[%s639_s0 + $0x18] sm:$0xff]   ;;  %13 = vst [vmem:[#allocation2] sm:$0x1] %v12_v39 }
   0x3   :  { %439 = vmatpush3.bf16.msra.mxu0 %v466_v0  ;;  %442 = vmatprep.mubr.msk.bf16.mxu0 %vm80_vm0, %v468_v2  ;;  %v472_v5 = vld [vmem:[%s640_s3] sm:$0xff]   ;;  %v473_v6 = vld [vmem:[%s640_s3 + $0x8] sm:$0xff]   ;;  %v474_v8 = vld [vmem:[%s640_s3 + $0x10] sm:$0xff]  }
   0x4   :  { %440 = vmatprep.subr.bf16.mxu0 %v467_v1  ;;  %450 = vmatprep.subr.bf16.mxu1 %v472_v5  ;;  %v475_v9 = vld [vmem:[%s640_s3 + $0x18] sm:$0xff]   ;;  %v402_v10 = vld [vmem:[%s641_s2] ss:$0 sm:$0xff] }
   0x5   :  { %451 = vmatpush3.bf16.msra.mxu1 %v472_v5  ;;  %v413_v40 = vld [vmem:[%s643_s4] ss:$0 sm:$0xff] }
   0x6   :  { %452 = vmatprep.subr.bf16.mxu1 %v473_v6  ;;  %v422_v46 = vld [vmem:[%s644_s5] ss:$0 sm:$0xff] }
   0x7   :  { %441 = vmatpush3.bf16.msra.mxu0 %v467_v1 }
   0x9   :  { %453 = vmatpush3.bf16.msra.mxu1 %v473_v6 }
   0xa   :  { %443 = vmatmul.mubr.msk.bf16.vlgmr.msra.gmra.mrb[0].mxu0 %vm80_vm0, %v469_v3  ;;  %454 = vmatprep.subr.bf16.mxu1 %v474_v8 }
   0xb   :  { %446 = vmatprep.mubr.msk.bf16.mxu0 %vm80_vm0, %v470_v4 }
   0xd   :  { %455 = vmatpush3.bf16.msra.mxu1 %v474_v8 }
   0xe   :  { %456 = vmatprep.subr.bf16.mxu1 %v475_v9 }
  0x11   :  { %457 = vmatpush3.bf16.msra.mxu1 %v475_v9 }
  0x12   :  { %447 = vmatmul.mubr.msk.bf16.gmra.mrb[4].mxu0 %vm80_vm0, %v471_v7 }
  0xdd   :  { %v444_v11 = vpop.f32.mrb[0].mxu0 }
  0xde   :  { %v136_v12 = vadd.f32 %v444_v11, %v402_v10  ;;  %v127_v13 = vpop.f32.mrb[1].mxu0 }
  0xdf   :  { %v128_v14 = vadd.f32 %v402_v10, %v127_v13  ;;  %v445_v15 = vpop.f32.mrb[2].mxu0 }
  0xe0   :  { %v139_v16 = vadd.f32 %v445_v15, %v402_v10  ;;  %v130_v17 = vpop.f32.mrb[3].mxu0  ;;  %v160_v19 = vmax.f32 %v136_v12, 0.0 }
  0xe1   :  { %v131_v18 = vadd.f32 %v402_v10, %v130_v17  ;;  %v158_v21 = vmax.f32 %v128_v14, 0.0 }
  0xe2   :  { %v161_v20 = vmax.f32 %v139_v16, 0.0 }
  0xe3   :  { %v159_v22 = vmax.f32 %v131_v18, 0.0  ;;  %v423_v18 = vld [vmem:[#allocation2] ss:$0 sm:$0xff] }
  0xe4   :  { %v167_v23 = vpack.c.bf16 %v161_v20, %v160_v19 }
  0xe5   :  { %v448_v24 = vpop.f32.mrb[4].mxu0  ;;  %v166_v25 = vpack.c.bf16 %v159_v22, %v158_v21 }
  0xe6   :  { %v152_v26 = vadd.f32 %v448_v24, %v402_v10  ;;  %v143_v27 = vpop.f32.mrb[5].mxu0 }
  0xe7   :  { %v144_v28 = vadd.f32 %v402_v10, %v143_v27  ;;  %v449_v29 = vpop.f32.mrb[6].mxu0  ;;  %458 = vmatprep.mubr.msk.bf16.mxu1 %vm209_vm1, %v166_v25 }
  0xe8   :  { %v155_v30 = vadd.f32 %v449_v29, %v402_v10  ;;  %v146_v31 = vpop.f32.mrb[7].mxu0  ;;  %459 = vmatmul.mubr.msk.bf16.vlgmr.msra.gmra.mrb[0].mxu1 %vm209_vm1, %v167_v23  ;;  %v164_v33 = vmax.f32 %v152_v26, 0.0 }
  0xe9   :  { %v147_v32 = vadd.f32 %v402_v10, %v146_v31  ;;  %v162_v35 = vmax.f32 %v144_v28, 0.0 }
  0xea   :  { %v165_v34 = vmax.f32 %v155_v30, 0.0 }
  0xeb   :  { %v163_v36 = vmax.f32 %v147_v32, 0.0 }
  0xec   :  { %v169_v37 = vpack.c.bf16 %v165_v34, %v164_v33 }
  0xed   :  { %v168_v38 = vpack.c.bf16 %v163_v36, %v162_v35 }
  0xef   :  { %462 = vmatprep.mubr.msk.bf16.mxu1 %vm209_vm1, %v168_v38 }
  0xf0   :  { %463 = vmatmul.mubr.msk.bf16.gmra.mrb[4].mxu1 %vm209_vm1, %v169_v37 }
 0x1bb   :  { %v460_v41 = vpop.f32.mrb[0].mxu1 }
 0x1bc   :  { %v265_v42 = vadd.f32 %v460_v41, %v413_v40  ;;  %v256_v43 = vpop.f32.mrb[1].mxu1 }
 0x1bd   :  { %v257_v44 = vadd.f32 %v413_v40, %v256_v43  ;;  %v461_v45 = vpop.f32.mrb[2].mxu1 }
 0x1be   :  { %v289_v47 = vmax.f32 %v265_v42, 0.0  ;;  %v268_v48 = vadd.f32 %v461_v45, %v413_v40  ;;  %v259_v49 = vpop.f32.mrb[3].mxu1 }
 0x1bf   :  { %v287_v50 = vmax.f32 %v257_v44, 0.0  ;;  %v260_v51 = vadd.f32 %v413_v40, %v259_v49 }
 0x1c0   :  { %v290_v52 = vmax.f32 %v268_v48, 0.0  ;;  %v304_v53 = vmul.f32 %v422_v46, %v289_v47 }
 0x1c1   :  { %v288_v54 = vmax.f32 %v260_v51, 0.0  ;;  %v302_v55 = vmul.f32 %v422_v46, %v287_v50 }
 0x1c2   :  { %v316_v56 = vsel %vm80_vm0, %v304_v53, 0.0  ;;  %v305_v57 = vmul.f32 %v422_v46, %v290_v52 }
 0x1c3   :  { %317 = vadd.xlane.f32.xlu1 %v316_v56  ;;  %v464_v58 = vpop.f32.mrb[4].mxu1  ;;  %v310_v59 = vsel %vm80_vm0, %v302_v55, 0.0  ;;  %v303_v60 = vmul.f32 %v422_v46, %v288_v54 }
 0x1c4   :  { %v281_v61 = vadd.f32 %v464_v58, %v413_v40  ;;  %v272_v62 = vpop.f32.mrb[5].mxu1  ;;  %311 = vadd.xlane.f32.xlu0 %v310_v59  ;;  %v319_v3 = vsel %vm80_vm0, %v305_v57, 0.0 }
 0x1c5   :  { %v273_v63 = vadd.f32 %v413_v40, %v272_v62  ;;  %v465_v0 = vpop.f32.mrb[6].mxu1  ;;  %v313_v7 = vsel %vm80_vm0, %v303_v60, 0.0 }
 0x1c6   :  { %v284_v1 = vadd.f32 %v465_v0, %v413_v40  ;;  %v275_v2 = vpop.f32.mrb[7].mxu1  ;;  %v293_v4 = vmax.f32 %v281_v61, 0.0 }
 0x1c7   :  { %v291_v5 = vmax.f32 %v273_v63, 0.0  ;;  %v276_v6 = vadd.f32 %v413_v40, %v275_v2  ;;  %320 = vadd.xlane.f32.xlu1 %v319_v3 }
 0x1c8   :  { %314 = vadd.xlane.f32.xlu0 %v313_v7  ;;  %v294_v8 = vmax.f32 %v284_v1, 0.0  ;;  %v308_v13 = vmul.f32 %v422_v46, %v293_v4 }
 0x1c9   :  { %v292_v9 = vmax.f32 %v276_v6, 0.0  ;;  %v306_v10 = vmul.f32 %v422_v46, %v291_v5 }
 0x1ca   :  { %v309_v15 = vmul.f32 %v422_v46, %v294_v8  ;;  %v328_v16 = vsel %vm80_vm0, %v308_v13, 0.0 }
 0x1cb   :  { %v322_v11 = vsel %vm80_vm0, %v306_v10, 0.0  ;;  %v307_v12 = vmul.f32 %v422_v46, %v292_v9 }
 0x1cc   :  { %323 = vadd.xlane.f32.xlu0 %v322_v11  ;;  %v331_v17 = vsel %vm80_vm0, %v309_v15, 0.0 }
 0x1cd   :  { %v325_v14 = vsel %vm80_vm0, %v307_v12, 0.0 }
 0x1ce   :  { %326 = vadd.xlane.f32.xlu1 %v325_v14 }
 0x1d0   :  { %329 = vadd.xlane.f32.xlu0 %v328_v16 }
 0x1d2   :  { %332 = vadd.xlane.f32.xlu1 %v331_v17 }
 0x250   :  { %v318_v19 = vpop.xlane.xlu1 %317 }
 0x251   :  { %v343_v20 = vadd.f32 %v423_v18, %v318_v19  ;;  %v312_v21 = vpop.xlane.xlu0 %311 }
 0x252   :  { %v341_v22 = vadd.f32 %v423_v18, %v312_v21 }
 0x253   :  { %v351_v23 = vsub.f32 0.0, %v343_v20 }
 0x254   :  { %v349_v24 = vsub.f32 0.0, %v341_v22  ;;  %v321_v25 = vpop.xlane.xlu1 %320 }
 0x255   :  { %v361_v26 = vmul.f32 1.442695, %v351_v23  ;;  %v344_v27 = vadd.f32 %v423_v18, %v321_v25  ;;  %v315_v28 = vpop.xlane.xlu0 %314 }
 0x256   :  { %v357_v29 = vmul.f32 1.442695, %v349_v24  ;;  %v342_v30 = vadd.f32 %v423_v18, %v315_v28 }
 0x257   :  { %476 = vpow2.f32 %v361_v26  ;;  %v352_v31 = vsub.f32 0.0, %v344_v27 }
 0x258   :  { %478 = vpow2.f32 %v357_v29  ;;  %v350_v32 = vsub.f32 0.0, %v342_v30 }
 0x259   :  { %v363_v33 = vmul.f32 1.442695, %v352_v31  ;;  %v324_v34 = vpop.xlane.xlu0 %323 }
 0x25a   :  { %v359_v35 = vmul.f32 1.442695, %v350_v32  ;;  %v345_v36 = vadd.f32 %v423_v18, %v324_v34 }
 0x25b   :  { %480 = vpow2.f32 %v363_v33  ;;  %v327_v37 = vpop.xlane.xlu1 %326 }
 0x25c   :  { %482 = vpow2.f32 %v359_v35  ;;  %v353_v38 = vsub.f32 0.0, %v345_v36  ;;  %v346_v39 = vadd.f32 %v423_v18, %v327_v37 }
 0x25d   :  { %v330_v40 = vpop.xlane.xlu0 %329 }
 0x25e   :  { %v365_v41 = vmul.f32 1.442695, %v353_v38  ;;  %v354_v42 = vsub.f32 0.0, %v346_v39  ;;  %v347_v43 = vadd.f32 %v423_v18, %v330_v40 }
 0x25f   :  { %v333_v44 = vpop.xlane.xlu1 %332 }
 0x260   :  { %484 = vpow2.f32 %v365_v41  ;;  %v367_v45 = vmul.f32 1.442695, %v354_v42  ;;  %v355_v46 = vsub.f32 0.0, %v347_v43  ;;  %v348_v47 = vadd.f32 %v423_v18, %v333_v44 }
 0x261   :  { %v477_v48 = vpop.eup %476 }
 0x262   :  { %v479_v49 = vpop.eup %478  ;;  %v375_v50 = vadd.f32 1.0, %v477_v48  ;;  %486 = vpow2.f32 %v367_v45  ;;  %v369_v51 = vmul.f32 1.442695, %v355_v46  ;;  %v356_v52 = vsub.f32 0.0, %v348_v47 }
 0x263   :  { %v373_v53 = vadd.f32 1.0, %v479_v49 }
 0x264   :  { %488 = vrcp.f32 %v375_v50  ;;  %v371_v54 = vmul.f32 1.442695, %v356_v52 }
 0x265   :  { %v481_v55 = vpop.eup %480  ;;  %490 = vrcp.f32 %v373_v53 }
 0x266   :  { %v483_v56 = vpop.eup %482  ;;  %v376_v57 = vadd.f32 1.0, %v481_v55  ;;  %492 = vpow2.f32 %v369_v51 }
 0x267   :  { %v374_v58 = vadd.f32 1.0, %v483_v56  ;;  %494 = vpow2.f32 %v371_v54 }
 0x268   :  { %496 = vrcp.f32 %v376_v57 }
 0x269   :  { %498 = vrcp.f32 %v374_v58 }
 0x26a   :  { %v485_v59 = vpop.eup %484 }
 0x26b   :  { %v377_v60 = vadd.f32 1.0, %v485_v59 }
 0x26c   :  { %v487_v61 = vpop.eup %486 }
 0x26d   :  { %500 = vrcp.f32 %v377_v60  ;;  %v378_v62 = vadd.f32 1.0, %v487_v61 }
 0x26e   :  { %v489_v63 = vpop.eup %488 }
 0x26f   :  { %v491_v0 = vpop.eup %490  ;;  %392 = vst.msk [vmem:[%s645_s7 + $0x10] sm:$0xff] %vm389_vm2, %v489_v63  ;;  %502 = vrcp.f32 %v378_v62 }
 0x270   :  { %v493_v1 = vpop.eup %492  ;;  %390 = vst.msk [vmem:[%s645_s7] sm:$0xff] %vm389_vm2, %v491_v0 }
 0x271   :  { %v495_v2 = vpop.eup %494  ;;  %v379_v3 = vadd.f32 1.0, %v493_v1 }
 0x272   :  { %v497_v4 = vpop.eup %496  ;;  %v380_v5 = vadd.f32 1.0, %v495_v2 }
 0x273   :  { %v499_v6 = vpop.eup %498  ;;  %393 = vst.msk [vmem:[%s645_s7 + $0x18] sm:$0xff] %vm389_vm2, %v497_v4  ;;  %504 = vrcp.f32 %v379_v3 }
 0x274   :  { %391 = vst.msk [vmem:[%s645_s7 + $0x8] sm:$0xff] %vm389_vm2, %v499_v6  ;;  %506 = vrcp.f32 %v380_v5 }
 0x277   :  { %v501_v7 = vpop.eup %500 }
 0x278   :  { %394 = vst.msk [vmem:[%s645_s7 + $0x20] sm:$0xff] %vm389_vm2, %v501_v7 }
 0x279   :  { %v503_v8 = vpop.eup %502 }
 0x27a   :  { %395 = vst.msk [vmem:[%s645_s7 + $0x28] sm:$0xff] %vm389_vm2, %v503_v8 }
 0x27d   :  { %v505_v9 = vpop.eup %504 }
 0x27e   :  { %v507_v10 = vpop.eup %506  ;;  %396 = vst.msk [vmem:[%s645_s7 + $0x30] sm:$0xff] %vm389_vm2, %v505_v9 }
 0x27f   :  { %397 = vst.msk [vmem:[%s645_s7 + $0x38] sm:$0xff] %vm389_vm2, %v507_v10 }

</bundles_post_ra>
